<compile_context>
chip_gen: v7x
topology: tpu7x:2x2x1
jax: 0.10.0
libtpu: 0.0.40
codegen_flags: <defaults>
</compile_context>

<pallas_src>
import jax
import jax.numpy as jnp
import numpy as np
from jax.experimental import pallas as pl
from jax.experimental.pallas import tpu as pltpu


# ---------------------------------------------------------------------------
# Fused kernel: softmax(logits) @ W  +  soft-target CE mean (negated)
# ---------------------------------------------------------------------------
def _genab_fused_kernel(logits_ref, w_ref, pred_ref, emb_ref, ll_ref):
    # logits_ref: (N, V)   flattened (B*L, V) target logits   [VMEM]
    # w_ref:      (V, H)   embedding table                    [VMEM]
    # pred_ref:   (N, V)   flattened prediction logits        [VMEM]
    # emb_ref:    (N, H)   softmax(logits) @ W                [VMEM out]
    # ll_ref:     (1, 1)   log-likelihood scalar              [SMEM out]
    x = logits_ref[...].astype(jnp.float32)                    # (N, V)
    m = jnp.max(x, axis=-1, keepdims=True)                     # stable softmax
    e = jnp.exp(x - m)                                         # -inf -> 0
    s = jnp.sum(e, axis=-1, keepdims=True)                     # (N, 1)
    # Exact reciprocal keeps ~1e-7 agreement with the reference; approx=True
    # would move it to the (idle) EUP at ~1e-4 relative error.
    inv_s = pl.reciprocal(s, approx=False)                     # (N, 1)

    # (1) w_embeddings: normalise AFTER the MXU — row scale on (N, H) instead
    # of an (N, V) divide before the matmul.
    emb_ref[...] = (
        jnp.dot(e, w_ref[...], preferred_element_type=jnp.float32) * inv_s
    )

    # (2) soft-target cross entropy (negated mean), reusing the same softmax:
    #     sum_v p * log_softmax(pred) = sum_v p*pz - lse     (sum_v p == 1)
    #     with p*pz = (e*pz) * inv_s  — p / log_softmax never materialised.
    pred = pred_ref[...].astype(jnp.float32)                   # (N, V)
    pm = jnp.max(pred, axis=-1, keepdims=True)
    pz = pred - pm
    lse = jnp.log(jnp.sum(jnp.exp(pz), axis=-1, keepdims=True))  # (N, 1)
    row_dot = jnp.sum(e * pz, axis=-1, keepdims=True) * inv_s     # (N, 1)
    n_rows = x.shape[0]
    # log_likelihood = -CE_mean = mean over rows of (row_dot - lse)
    ll_ref[0, 0] = jnp.sum(row_dot - lse) * (1.0 / n_rows)


# ---------------------------------------------------------------------------
# GenAB forward (Pallas hot path)
# ---------------------------------------------------------------------------
def gen_ab_forward(logits, W_matrix, prediction_logits):
    """Returns (w_embeddings, log_likelihood).

    w_embeddings   = softmax(logits) @ W_matrix      (input to BERT embeddings)
    log_likelihood = -cross_entropy(prediction_logits, softmax(logits), 'mean')
    """
    B, L, V = logits.shape
    H = W_matrix.shape[1]
    N = B * L

    # Lane-dense 2-D presentation: drop the size-1 leading dims, flatten (B,L).
    logits_2d = logits.reshape(N, V)
    pred_2d = prediction_logits.reshape(N, V)

    w_emb_2d, ll = pl.pallas_call(
        _genab_fused_kernel,
        out_shape=(
            jax.ShapeDtypeStruct((N, H), jnp.float32),
            jax.ShapeDtypeStruct((1, 1), jnp.float32),
        ),
        in_specs=[
            pl.BlockSpec(memory_space=pltpu.MemorySpace.VMEM),
            pl.BlockSpec(memory_space=pltpu.MemorySpace.VMEM),
            pl.BlockSpec(memory_space=pltpu.MemorySpace.VMEM),
        ],
        out_specs=(
            pl.BlockSpec(memory_space=pltpu.MemorySpace.VMEM),
            pl.BlockSpec(memory_space=pltpu.MemorySpace.SMEM),
        ),
    )(logits_2d, W_matrix, pred_2d)

    w_embeddings = w_emb_2d.reshape(B, L, H)
    log_likelihood = ll[0, 0]
    # TODO(synk): the AntiBERTy BERT encoder forward (prediction_logits,
    # hidden_states, attentions, species_logits) and the IgFold structure
    # models (coords, prmsd quantile selection) are external pretrained
    # networks with no in-script definition; not reproducible as a synthetic
    # Pallas kernel.
    return w_embeddings, log_likelihood


if __name__ == "__main__":
    # Small, deterministic synthetic shapes consistent with the module:
    #  B=2 chains (VH, VL), L=24 padded tokens, V=25 vocab classes, H=32 hidden.
    B, L, V, H = 2, 24, 25, 32
    SUB_INF = 10.0

    key = jax.random.PRNGKey(0)
    k_ids, k_w, k_pred = jax.random.split(key, 3)

    # Mimic __init__: logits = one_hot(token_ids, 25) * sub_infinity, with the
    # special-token slots [0:5] masked to -inf where they are zero.
    token_ids = jax.random.randint(k_ids, (B, L), 5, V)
    logits = jax.nn.one_hot(token_ids, V, dtype=jnp.float32) * SUB_INF
    special = logits[:, :, 0:5]
    logits = logits.at[:, :, 0:5].set(
        jnp.where(special == 0.0, -jnp.inf, special))

    # W_matrix ~ antiberty.bert.embeddings.word_embeddings.weight  -> (V, H)
    W_matrix = jax.random.normal(k_w, (V, H), dtype=jnp.float32) * 0.02

    # Synthetic stand-in for outputs.prediction_logits (B, L, V).
    prediction_logits = jax.random.normal(k_pred, (B, L, V), dtype=jnp.float32)

    w_emb, log_lik = jax.jit(gen_ab_forward)(logits, W_matrix, prediction_logits)
    jax.block_until_ready((w_emb, log_lik))

    # Reference check in plain JAX.
    ref_probs = jax.nn.softmax(logits, axis=-1)
    ref_w_emb = ref_probs @ W_matrix
    ref_logp = jax.nn.log_softmax(prediction_logits, axis=-1)
    ref_log_lik = jnp.mean(jnp.sum(ref_probs * ref_logp, axis=-1))

    assert np.allclose(np.asarray(w_emb), np.asarray(ref_w_emb),
                       rtol=1e-5, atol=1e-5)
    assert np.allclose(float(log_lik), float(ref_log_lik),
                       rtol=1e-5, atol=1e-5)

    print("KERNEL_OK")
</pallas_src>

<mosaic_0001>
module attributes {stable_mosaic.version = 11 : i64} {
  func.func @_genab_fused_kernel(%arg0: memref<48x25xf32, #tpu.memory_space<vmem>>, %arg1: memref<25x32xf32, #tpu.memory_space<vmem>>, %arg2: memref<48x25xf32, #tpu.memory_space<vmem>>, %arg3: memref<48x32xf32, #tpu.memory_space<vmem>>, %arg4: memref<1x1xf32, #tpu.memory_space<smem>>) attributes {dimension_semantics = [], scalar_prefetch = 0 : i64, scratch_operands = 0 : i64, tpu.core_type = #tpu.core_type<tc>} {
    %c0 = arith.constant 0 : index
    %c0_0 = arith.constant 0 : index
    %0 = vector.load %arg0[%c0, %c0_0] : memref<48x25xf32, #tpu.memory_space<vmem>>, vector<48x25xf32>
    %cst = arith.constant dense<0xFF800000> : vector<48xf32>
    %1 = vector.multi_reduction <maximumf>, %0, %cst [1] : vector<48x25xf32> to vector<48xf32>
    %2 = vector.shape_cast %1 : vector<48xf32> to vector<48x1xf32>
    %3 = vector.broadcast %2 : vector<48x1xf32> to vector<48x25xf32>
    %4 = arith.subf %0, %3 : vector<48x25xf32>
    %5 = math.exp %4 : vector<48x25xf32>
    %cst_1 = arith.constant dense<0.000000e+00> : vector<48xf32>
    %6 = vector.multi_reduction <add>, %5, %cst_1 [1] : vector<48x25xf32> to vector<48xf32>
    %7 = vector.shape_cast %6 : vector<48xf32> to vector<48x1xf32>
    %8 = tpu.reciprocal %7 : vector<48x1xf32> -> vector<48x1xf32>
    %c0_2 = arith.constant 0 : index
    %c0_3 = arith.constant 0 : index
    %9 = vector.load %arg1[%c0_2, %c0_3] : memref<25x32xf32, #tpu.memory_space<vmem>>, vector<25x32xf32>
    %cst_4 = arith.constant dense<0.000000e+00> : vector<48x32xf32>
    %10 = tpu.matmul %5, %9, %cst_4 {dimension_numbers = #tpu.dot_dimension_numbers<[1], [0], [0], [1], [0, 0, 1, 1], [], []>} : vector<48x25xf32>, vector<25x32xf32>, vector<48x32xf32> -> vector<48x32xf32>
    %11 = vector.broadcast %8 : vector<48x1xf32> to vector<48x32xf32>
    %12 = arith.mulf %10, %11 : vector<48x32xf32>
    %c0_5 = arith.constant 0 : index
    %c0_6 = arith.constant 0 : index
    %13 = vector.load %arg3[%c0_5, %c0_6] : memref<48x32xf32, #tpu.memory_space<vmem>>, vector<48x32xf32>
    tpu.vector_store %arg3[%c0_5, %c0_6], %12 {strides = array<i32>} : memref<48x32xf32, #tpu.memory_space<vmem>>, vector<48x32xf32>,
    %c0_7 = arith.constant 0 : index
    %c0_8 = arith.constant 0 : index
    %14 = vector.load %arg2[%c0_7, %c0_8] : memref<48x25xf32, #tpu.memory_space<vmem>>, vector<48x25xf32>
    %cst_9 = arith.constant dense<0xFF800000> : vector<48xf32>
    %15 = vector.multi_reduction <maximumf>, %14, %cst_9 [1] : vector<48x25xf32> to vector<48xf32>
    %16 = vector.shape_cast %15 : vector<48xf32> to vector<48x1xf32>
    %17 = vector.broadcast %16 : vector<48x1xf32> to vector<48x25xf32>
    %18 = arith.subf %14, %17 : vector<48x25xf32>
    %19 = math.exp %18 : vector<48x25xf32>
    %cst_10 = arith.constant dense<0.000000e+00> : vector<48xf32>
    %20 = vector.multi_reduction <add>, %19, %cst_10 [1] : vector<48x25xf32> to vector<48xf32>
    %21 = vector.shape_cast %20 : vector<48xf32> to vector<48x1xf32>
    %22 = math.log %21 : vector<48x1xf32>
    %23 = arith.mulf %5, %18 : vector<48x25xf32>
    %cst_11 = arith.constant dense<0.000000e+00> : vector<48xf32>
    %24 = vector.multi_reduction <add>, %23, %cst_11 [1] : vector<48x25xf32> to vector<48xf32>
    %25 = vector.shape_cast %24 : vector<48xf32> to vector<48x1xf32>
    %26 = arith.mulf %25, %8 : vector<48x1xf32>
    %27 = arith.subf %26, %22 : vector<48x1xf32>
    %28 = vector.shape_cast %27 : vector<48x1xf32> to vector<1x48x1xf32>
    %cst_12 = arith.constant dense<0.000000e+00> : vector<1xf32>
    %29 = vector.multi_reduction <add>, %28, %cst_12 [1, 2] : vector<1x48x1xf32> to vector<1xf32>
    %30 = vector.shape_cast %29 : vector<1xf32> to vector<1x1x1xf32>
    %31 = vector.extract %30[0, 0, 0] : f32 from vector<1x1x1xf32>
    %cst_13 = arith.constant 0.020833334 : f32
    %32 = arith.mulf %31, %cst_13 : f32
    %c0_14 = arith.constant 0 : index
    %c0_15 = arith.constant 0 : index
    %33 = memref.load %arg4[%c0_14, %c0_15] : memref<1x1xf32, #tpu.memory_space<smem>>
    memref.store %32, %arg4[%c0_14, %c0_15] : memref<1x1xf32, #tpu.memory_space<smem>>
    return
  }
}

</mosaic_0001>

<bundles_post_ra>
// kernel: gen_ab_forward.1
= control target key start
LH: loop header
LB: loop body
LE: loop exit
PB: predicated region body
PF: predicated region fallthrough
CT: control target
= control target key end

     0   :  { %10 = vsyncpa [#allocation3], 0  ;;  %s839_s0 = inlined_call_operand.hbm [shape: f32[48,25], index: 0, kind: input, shape index: {}]   ;;  %s840_s1 = inlined_call_operand.hbm [shape: f32[25,32], index: 1, kind: input, shape index: {}]   ;;  %s841_s2 = inlined_call_operand.hbm [shape: f32[48,25], index: 2, kind: input, shape index: {}]   ;;  %s842_s3 = inlined_call_operand.hbm [shape: f32[48,32], index: 3, kind: output, shape index: {0}]   ;;  %s843_s4 = inlined_call_operand.hbm [shape: f32[1,1], index: 4, kind: output, shape index: {1}]  }
   0x1   :  { %11 = vsyncpa [#allocation7], 0 }
   0x2   :  { %12 = vsyncpa [#allocation4], 0 }
   0x3   :  { %13 = vsyncpa [#allocation5], 0  ;;  %s635_s15 = smov [#allocation6]   ;;  %s636_s17 = smov [#allocation2]  }
   0x4   :  { %s31_s16 = sshll.u32 %s635_s15, 4  ;;  %s19_s18 = sshll.u32 %s636_s17, 4  ;;  %s32_s16 = int_to_ptr.vmem [resolvable:$true] %s31_s16  ;;  %s668_s18 = int_to_ptr.vmem [resolvable:$true] %s19_s18 }
   0x5   :  { %s529_s21 = scalar_lea.hbm %s840_s1, 512 }
   0x6   :  { %p530_p0 = scmp.ne.s32.totalorder %s840_s1, %s529_s21  ;;  %p533_p1 = scmp.lt.u32.totalorder %s529_s21, %s840_s1 }
   0x8   :  { %p535_p2 = pnand %p533_p1, %p530_p0 }
   0xa   :  { %538 = shalt.err (!%p535_p2)
}
   0xb   :  { %s539_s26 = scalar_lea.vmem %s32_s16, 512  ;;  %p544_p4 = scmp.lt.s32.totalorder %s32_s16, %s32_s16 }
   0xc   :  { %p540_p3 = scmp.ne.s32.totalorder %s32_s16, %s539_s26  ;;  %p545_p5 = scmp.lt.s32.totalorder %s539_s26, %s539_s26 }
   0xe   :  { %p546_p6 = por %p545_p5, %p544_p4 }
  0x10   :  { %p547_p7 = pnand %p546_p6, %p540_p3 }
  0x12   :  { %550 = shalt.err (!%p547_p7)
}
  0x13   :  { %s637_s27 = smov 128   ;;  %s638_s28 = smov 8  }
  0x14   :  { %37 = dma.hbm_to_vmem [thread:$0]  %s840_s1, 512, %s32_s16, [#allocation7], %s637_s27, %s637_s27, %s638_s28  }
  0x15   :  { %s551_s7 = scalar_lea.hbm %s839_s0, 768 }
  0x16   :  { %p552_p8 = scmp.ne.s32.totalorder %s839_s0, %s551_s7  ;;  %p555_p9 = scmp.lt.u32.totalorder %s551_s7, %s839_s0 }
  0x18   :  { %p557_p10 = pnand %p555_p9, %p552_p8 }
  0x1a   :  { %560 = shalt.err (!%p557_p10)
}
  0x1b   :  { %s561_s12 = scalar_lea.vmem %s668_s18, 768  ;;  %p566_p12 = scmp.lt.s32.totalorder %s668_s18, %s668_s18 }
  0x1c   :  { %p562_p11 = scmp.ne.s32.totalorder %s668_s18, %s561_s12  ;;  %p567_p13 = scmp.lt.s32.totalorder %s561_s12, %s561_s12 }
  0x1e   :  { %p568_p0 = por %p567_p13, %p566_p12 }
  0x20   :  { %p569_p1 = pnand %p568_p0, %p562_p11 }
  0x22   :  { %572 = shalt.err (!%p569_p1)
}
  0x23   :  { %25 = dma.hbm_to_vmem [thread:$0]  %s839_s0, 768, %s668_s18, [#allocation3], %s637_s27, %s637_s27, %s638_s28  }
  0x24   :  { %s639_s14 = smov [#allocation8]   ;;  %s573_s19 = scalar_lea.hbm %s841_s2, 768 }
  0x25   :  { %s43_s15 = sshll.u32 %s639_s14, 4  ;;  %p574_p2 = scmp.ne.s32.totalorder %s841_s2, %s573_s19  ;;  %s44_s15 = int_to_ptr.vmem [resolvable:$true] %s43_s15 }
  0x26   :  { %p577_p3 = scmp.lt.u32.totalorder %s573_s19, %s841_s2 }
  0x28   :  { %p579_p4 = pnand %p577_p3, %p574_p2 }
  0x2a   :  { %582 = shalt.err (!%p579_p4)
}
  0x2b   :  { %s583_s24 = scalar_lea.vmem %s44_s15, 768  ;;  %p588_p6 = scmp.lt.s32.totalorder %s44_s15, %s44_s15 }
  0x2c   :  { %p584_p5 = scmp.ne.s32.totalorder %s44_s15, %s583_s24  ;;  %p589_p7 = scmp.lt.s32.totalorder %s583_s24, %s583_s24 }
  0x2e   :  { %p590_p8 = por %p589_p7, %p588_p6 }
  0x30   :  { %p591_p9 = pnand %p590_p8, %p584_p5 }
  0x32   :  { %594 = shalt.err (!%p591_p9)
}
  0x33   :  { %49 = dma.hbm_to_vmem [thread:$0]  %s841_s2, 768, %s44_s15, [#allocation7], %s637_s27, %s637_s27, %s638_s28  }
  0x34   :  { %627 = dma.done.wait [#allocation3], 768  }
  0x35   :  { %628 = vsyncadd [#allocation3], 4294966528 }
  0x36   :  { %629 = dma.done.wait [#allocation7], 1280  }
  0x37   :  { %630 = vsyncadd [#allocation7], 4294966016  ;;  %vm65_vm0 = vcmask 203776   ;;  %v59_v0 = vld [vmem:[#allocation2] sm:$0xff]  ;;  %v260_v1 = vld [vmem:[#allocation8] sm:$0xff]  ;;  %vm148_vm1 = vcmask 1040384  }
  0x38   :  { %v720_v2 = vld [vmem:[#allocation2 + $0x8] sm:$0xff]  ;;  %v66_v3 = vsel %vm65_vm0, %v59_v0, -inf  ;;  %v266_v4 = vsel %vm65_vm0, %v260_v1, -inf  ;;  %v261_v5 = vld [vmem:[#allocation8 + $0x8] sm:$0xff]  ;;  %v727_v8 = vld [vmem:[#allocation2 + $0x10] sm:$0xff]  ;;  %vm640_vm2 = vmmov 1  }
  0x39   :  { %67 = vmax.xlane.f32.xlu0 %v66_v3  ;;  %267 = vmax.xlane.f32.xlu1 %v266_v4  ;;  %v69_v6 = vsel %vm65_vm0, %v720_v2, -inf  ;;  %v269_v7 = vsel %vm65_vm0, %v261_v5, -inf  ;;  %v262_v9 = vld [vmem:[#allocation8 + $0x10] sm:$0xff]  ;;  %v72_v10 = vsel %vm65_vm0, %v727_v8, -inf  ;;  %v732_v12 = vld [vmem:[#allocation2 + $0x18] sm:$0xff]  ;;  %v263_v13 = vld [vmem:[#allocation8 + $0x18] sm:$0xff] }
  0x3a   :  { %v272_v11 = vsel %vm65_vm0, %v262_v9, -inf  ;;  %v75_v14 = vsel %vm65_vm0, %v732_v12, -inf  ;;  %v275_v15 = vsel %vm65_vm0, %v263_v13, -inf  ;;  %v737_v16 = vld [vmem:[#allocation2 + $0x20] sm:$0xff]  ;;  %v739_v17 = vld [vmem:[#allocation8 + $0x20] sm:$0xff]  ;;  %v745_v20 = vld [vmem:[#allocation2 + $0x28] sm:$0xff] }
  0x3b   :  { %v78_v18 = vsel %vm65_vm0, %v737_v16, -inf  ;;  %v278_v19 = vsel %vm65_vm0, %v739_v17, -inf  ;;  %v747_v21 = vld [vmem:[#allocation8 + $0x28] sm:$0xff]  ;;  %v81_v22 = vsel %vm65_vm0, %v745_v20, -inf  ;;  %v126_v24 = vld [vmem:[#allocation6] sm:$0xff]  ;;  %v128_v27 = vld [vmem:[#allocation6 + $0x10] sm:$0xff] }
  0x3c   :  { %v281_v23 = vsel %vm65_vm0, %v747_v21, -inf  ;;  %v127_v25 = vld [vmem:[#allocation6 + $0x8] sm:$0xff]  ;;  %v129_v28 = vld [vmem:[#allocation6 + $0x18] sm:$0x1]  ;;  %vm462_vm3 = vmpackc.low %vm148_vm1, %vm640_vm2  ;;  %vm368_vm4 = vcmask 7168   ;;  %vm253_vm5 = vcmask 261120  }
  0x3d   :  { %70 = vmax.xlane.f32.xlu0 %v69_v6  ;;  %270 = vmax.xlane.f32.xlu1 %v269_v7  ;;  %v457_v26 = vpack.c.bf16 %v127_v25, %v126_v24  ;;  %v461_v29 = vpack.c.bf16 %v129_v28, %v128_v27  ;;  %s641_s2 = smov [#allocation9]  }
  0x3e   :  { %s397_s25 = sshll.u32 %s641_s2, 4  ;;  %s398_s25 = int_to_ptr.vmem [resolvable:$true] %s397_s25 }
  0x3f   :  { %458 = vmatprep.subr.bf16.mxu0 %v457_v26  ;;  %467 = vmatprep.subr.bf16.mxu1 %v457_v26  ;;  %s595_s26 = scalar_lea.vmem %s398_s25, 768  ;;  %p600_p11 = scmp.lt.s32.totalorder %s398_s25, %s398_s25 }
  0x40   :  { %460 = vmatpush3.bf16.msra.mxu0 %v457_v26  ;;  %469 = vmatpush3.bf16.msra.mxu1 %v457_v26  ;;  %p596_p10 = scmp.ne.s32.totalorder %s398_s25, %s595_s26  ;;  %p601_p12 = scmp.lt.s32.totalorder %s595_s26, %s595_s26 }
  0x41   :  { %73 = vmax.xlane.f32.xlu0 %v72_v10  ;;  %273 = vmax.xlane.f32.xlu1 %v272_v11 }
  0x42   :  { %463 = vmatprep.subr.msk.bf16.mxu0 %vm462_vm3, %v461_v29  ;;  %468 = vmatprep.subr.msk.bf16.mxu1 %vm462_vm3, %v461_v29  ;;  %p602_p13 = por %p601_p12, %p600_p11 }
  0x44   :  { %466 = vmatpush3.bf16.msk.msra.mxu0 %vm462_vm3, %v461_v29  ;;  %470 = vmatpush3.bf16.msk.msra.mxu1 %vm462_vm3, %v461_v29  ;;  %p603_p0 = pnand %p602_p13, %p596_p10 }
  0x45   :  { %76 = vmax.xlane.f32.xlu0 %v75_v14  ;;  %276 = vmax.xlane.f32.xlu1 %v275_v15 }
  0x49   :  { %79 = vmax.xlane.f32.xlu0 %v78_v18  ;;  %279 = vmax.xlane.f32.xlu1 %v278_v19 }
  0x4d   :  { %82 = vmax.xlane.f32.xlu0 %v81_v22  ;;  %282 = vmax.xlane.f32.xlu1 %v281_v23 }
  0xc6   :  { %v68_v30 = vpop.xlane.xlu0 %67  ;;  %v268_v31 = vpop.xlane.xlu1 %267 }
  0xc7   :  { %v84_v32 = vsub.f32 %v59_v0, %v68_v30  ;;  %v753_v33 = vsub.f32 %v260_v1, %v268_v31 }
  0xc9   :  { %v90_v34 = vmul.f32 1.442695, %v84_v32  ;;  %v290_v35 = vmul.f32 1.442695, %v753_v33 }
  0xca   :  { %v71_v36 = vpop.xlane.xlu0 %70  ;;  %v271_v37 = vpop.xlane.xlu1 %270 }
  0xcb   :  { %481 = vpow2.f32 %v90_v34  ;;  %v85_v38 = vsub.f32 %v720_v2, %v71_v36  ;;  %v757_v39 = vsub.f32 %v261_v5, %v271_v37 }
  0xcc   :  { %483 = vpow2.f32 %v290_v35 }
  0xcd   :  { %v92_v40 = vmul.f32 1.442695, %v85_v38  ;;  %v292_v41 = vmul.f32 1.442695, %v757_v39 }
  0xce   :  { %v74_v42 = vpop.xlane.xlu0 %73  ;;  %v274_v43 = vpop.xlane.xlu1 %273 }
  0xcf   :  { %485 = vpow2.f32 %v92_v40  ;;  %v86_v44 = vsub.f32 %v727_v8, %v74_v42  ;;  %v761_v45 = vsub.f32 %v262_v9, %v274_v43 }
  0xd0   :  { %487 = vpow2.f32 %v292_v41 }
  0xd1   :  { %v94_v46 = vmul.f32 1.442695, %v86_v44  ;;  %v294_v47 = vmul.f32 1.442695, %v761_v45 }
  0xd2   :  { %v77_v48 = vpop.xlane.xlu0 %76  ;;  %v277_v49 = vpop.xlane.xlu1 %276 }
  0xd3   :  { %489 = vpow2.f32 %v94_v46  ;;  %v87_v50 = vsub.f32 %v732_v12, %v77_v48  ;;  %v765_v51 = vsub.f32 %v263_v13, %v277_v49 }
  0xd4   :  { %491 = vpow2.f32 %v294_v47 }
  0xd5   :  { %v482_v52 = vpop.eup %481  ;;  %v96_v53 = vmul.f32 1.442695, %v87_v50  ;;  %v296_v54 = vmul.f32 1.442695, %v765_v51 }
  0xd6   :  { %v484_v55 = vpop.eup %483  ;;  %448 = vmatprep.mubr.msk.f32.mxu0 %vm65_vm0, %v482_v52  ;;  %v80_v56 = vpop.xlane.xlu0 %79  ;;  %v102_v57 = vsel %vm65_vm0, %v482_v52, 0.0  ;;  %v332_v25 = vmul.f32 %v482_v52, %v753_v33 }
  0xd7   :  { %v280_v58 = vpop.xlane.xlu1 %279  ;;  %493 = vpow2.f32 %v96_v53  ;;  %v88_v59 = vsub.f32 %v737_v16, %v80_v56  ;;  %103 = vadd.xlane.f32.xlu0 %v102_v57  ;;  %v302_v61 = vsel %vm65_vm0, %v484_v55, 0.0 }
  0xd8   :  { %v288_v60 = vsub.f32 %v739_v17, %v280_v58  ;;  %495 = vpow2.f32 %v296_v54  ;;  %v338_v27 = vsel %vm65_vm0, %v332_v25, 0.0 }
  0xd9   :  { %v486_v62 = vpop.eup %485  ;;  %v98_v63 = vmul.f32 1.442695, %v88_v59 }
  0xda   :  { %v298_v0 = vmul.f32 1.442695, %v288_v60  ;;  %v488_v1 = vpop.eup %487  ;;  %449 = vmatmul.mubr.msk.f32.vlgmr.msra.gmra.mrb[0].mxu0 %vm65_vm0, %v486_v62  ;;  %v83_v2 = vpop.xlane.xlu0 %82  ;;  %v105_v3 = vsel %vm65_vm0, %v486_v62, 0.0  ;;  %v333_v28 = vmul.f32 %v486_v62, %v757_v39 }
  0xdb   :  { %v283_v4 = vpop.xlane.xlu1 %282  ;;  %497 = vpow2.f32 %v98_v63  ;;  %v89_v5 = vsub.f32 %v745_v20, %v83_v2  ;;  %303 = vadd.xlane.f32.xlu0 %v302_v61  ;;  %106 = vadd.xlane.f32.xlu1 %v105_v3  ;;  %v305_v7 = vsel %vm65_vm0, %v488_v1, 0.0 }
  0xdc   :  { %v289_v6 = vsub.f32 %v747_v21, %v283_v4  ;;  %499 = vpow2.f32 %v298_v0  ;;  %v341_v30 = vsel %vm65_vm0, %v333_v28, 0.0 }
  0xdd   :  { %v490_v8 = vpop.eup %489  ;;  %v100_v9 = vmul.f32 1.442695, %v89_v5 }
  0xde   :  { %v300_v10 = vmul.f32 1.442695, %v289_v6  ;;  %v492_v11 = vpop.eup %491  ;;  %v108_v12 = vsel %vm65_vm0, %v490_v8, 0.0  ;;  %451 = vmatprep.mubr.msk.f32.mxu1 %vm65_vm0, %v490_v8  ;;  %v334_v29 = vmul.f32 %v490_v8, %v761_v45 }
  0xdf   :  { %501 = vpow2.f32 %v100_v9  ;;  %306 = vadd.xlane.f32.xlu1 %v305_v7  ;;  %109 = vadd.xlane.f32.xlu0 %v108_v12  ;;  %v308_v13 = vsel %vm65_vm0, %v492_v11, 0.0 }
  0xe0   :  { %503 = vpow2.f32 %v300_v10  ;;  %v344_v31 = vsel %vm65_vm0, %v334_v29, 0.0 }
  0xe1   :  { %v494_v14 = vpop.eup %493 }
  0xe2   :  { %v496_v15 = vpop.eup %495  ;;  %452 = vmatmul.mubr.msk.f32.vlgmr.msra.gmra.mrb[0].mxu1 %vm65_vm0, %v494_v14  ;;  %v111_v16 = vsel %vm65_vm0, %v494_v14, 0.0  ;;  %v335_v32 = vmul.f32 %v494_v14, %v765_v51 }
  0xe3   :  { %309 = vadd.xlane.f32.xlu1 %v308_v13  ;;  %112 = vadd.xlane.f32.xlu0 %v111_v16  ;;  %v311_v17 = vsel %vm65_vm0, %v496_v15, 0.0 }
  0xe4   :  { %v347_v33 = vsel %vm65_vm0, %v335_v32, 0.0 }
  0xe5   :  { %v498_v18 = vpop.eup %497 }
  0xe6   :  { %v500_v19 = vpop.eup %499  ;;  %v114_v20 = vsel %vm65_vm0, %v498_v18, 0.0  ;;  %454 = vmatprep.mubr.msk.f32.mxu1 %vm65_vm0, %v498_v18  ;;  %v336_v34 = vmul.f32 %v498_v18, %v288_v60 }
  0xe7   :  { %312 = vadd.xlane.f32.xlu1 %v311_v17  ;;  %115 = vadd.xlane.f32.xlu0 %v114_v20  ;;  %v314_v21 = vsel %vm65_vm0, %v500_v19, 0.0 }
  0xe8   :  { %v350_v35 = vsel %vm65_vm0, %v336_v34, 0.0 }
  0xe9   :  { %v502_v22 = vpop.eup %501 }
  0xea   :  { %v504_v23 = vpop.eup %503  ;;  %455 = vmatmul.mubr.msk.f32.gmra.mrb[2].mxu1 %vm65_vm0, %v502_v22  ;;  %v117_v24 = vsel %vm65_vm0, %v502_v22, 0.0  ;;  %v337_v36 = vmul.f32 %v502_v22, %v289_v6 }
  0xeb   :  { %315 = vadd.xlane.f32.xlu1 %v314_v21  ;;  %118 = vadd.xlane.f32.xlu0 %v117_v24  ;;  %v317_v26 = vsel %vm65_vm0, %v504_v23, 0.0 }
  0xec   :  { %v353_v37 = vsel %vm65_vm0, %v337_v36, 0.0 }
  0xef   :  { %318 = vadd.xlane.f32.xlu1 %v317_v26  ;;  %339 = vadd.xlane.f32.xlu0 %v338_v27 }
  0xf3   :  { %342 = vadd.xlane.f32.xlu1 %v341_v30  ;;  %345 = vadd.xlane.f32.xlu0 %v344_v31 }
  0xf7   :  { %348 = vadd.xlane.f32.xlu1 %v347_v33  ;;  %351 = vadd.xlane.f32.xlu0 %v350_v35 }
  0xfb   :  { %354 = vadd.xlane.f32.xlu1 %v353_v37 }
 0x164   :  { %v104_v38 = vpop.xlane.xlu0 %103 }
 0x165   :  { %505 = vrcp.f32 %v104_v38 }
 0x168   :  { %v107_v39 = vpop.xlane.xlu1 %106  ;;  %v304_v40 = vpop.xlane.xlu0 %303 }
 0x169   :  { %507 = vlog2.f32 %v304_v40 }
 0x16c   :  { %v307_v41 = vpop.xlane.xlu1 %306  ;;  %v110_v42 = vpop.xlane.xlu0 %109 }
 0x16d   :  { %509 = vlog2.f32 %v307_v41 }
 0x16f   :  { %v506_v49 = vpop.eup %505 }
 0x170   :  { %v310_v43 = vpop.xlane.xlu1 %309  ;;  %v113_v44 = vpop.xlane.xlu0 %112 }
 0x171   :  { %511 = vlog2.f32 %v310_v43 }
 0x172   :  { %513 = vrcp.f32 %v107_v39 }
 0x173   :  { %515 = vrcp.f32 %v110_v42  ;;  %v508_v50 = vpop.eup %507 }
 0x174   :  { %v313_v45 = vpop.xlane.xlu1 %312  ;;  %v116_v46 = vpop.xlane.xlu0 %115  ;;  %v321_v57 = vmul.f32 0.6931472, %v508_v50 }
 0x175   :  { %517 = vlog2.f32 %v313_v45 }
 0x176   :  { %519 = vrcp.f32 %v113_v44 }
 0x177   :  { %v510_v53 = vpop.eup %509 }
 0x178   :  { %v316_v47 = vpop.xlane.xlu1 %315  ;;  %v119_v48 = vpop.xlane.xlu0 %118  ;;  %v323_v59 = vmul.f32 0.6931472, %v510_v53 }
 0x179   :  { %521 = vlog2.f32 %v316_v47 }
 0x17a   :  { %523 = vrcp.f32 %v116_v46 }
 0x17b   :  { %v512_v55 = vpop.eup %511 }
 0x17c   :  { %v319_v51 = vpop.xlane.xlu1 %318  ;;  %v340_v52 = vpop.xlane.xlu0 %339  ;;  %v325_v63 = vmul.f32 0.6931472, %v512_v55 }
 0x17d   :  { %525 = vlog2.f32 %v319_v51  ;;  %v356_v54 = vmul.f32 %v506_v49, %v340_v52  ;;  %v514_v56 = vpop.eup %513 }
 0x17e   :  { %527 = vrcp.f32 %v119_v48  ;;  %v516_v58 = vpop.eup %515 }
 0x17f   :  { %v518_v62 = vpop.eup %517  ;;  %v362_v0 = vsub.f32 %v356_v54, %v321_v57 }
 0x180   :  { %v343_v60 = vpop.xlane.xlu1 %342  ;;  %v346_v61 = vpop.xlane.xlu0 %345  ;;  %v327_v8 = vmul.f32 0.6931472, %v518_v62 }
 0x181   :  { %v357_v1 = vmul.f32 %v514_v56, %v343_v60  ;;  %v358_v2 = vmul.f32 %v516_v58, %v346_v61  ;;  %v520_v3 = vpop.eup %519  ;;  %v369_v12 = vsel %vm368_vm4, %v362_v0, 0.0 }
 0x183   :  { %v522_v4 = vpop.eup %521  ;;  %v363_v5 = vsub.f32 %v357_v1, %v323_v59  ;;  %v364_v6 = vsub.f32 %v358_v2, %v325_v63 }
 0x184   :  { %v524_v7 = vpop.eup %523  ;;  %v329_v9 = vmul.f32 0.6931472, %v522_v4  ;;  %v349_v10 = vpop.xlane.xlu1 %348 }
 0x185   :  { %v352_v11 = vpop.xlane.xlu0 %351  ;;  %v370_v13 = vsel %vm368_vm4, %v363_v5, 0.0  ;;  %v359_v14 = vmul.f32 %v520_v3, %v349_v10  ;;  %v372_v18 = vsel %vm368_vm4, %v364_v6, 0.0 }
 0x186   :  { %v360_v15 = vmul.f32 %v524_v7, %v352_v11  ;;  %v371_v16 = vadd.f32 %v370_v13, %v369_v12 }
 0x187   :  { %v526_v17 = vpop.eup %525  ;;  %v365_v19 = vsub.f32 %v359_v14, %v327_v8 }
 0x188   :  { %v366_v20 = vsub.f32 %v360_v15, %v329_v9  ;;  %v528_v21 = vpop.eup %527  ;;  %v331_v22 = vmul.f32 0.6931472, %v526_v17  ;;  %v373_v23 = vadd.f32 %v372_v18, %v371_v16  ;;  %v355_v24 = vpop.xlane.xlu1 %354 }
 0x189   :  { %v374_v25 = vsel %vm368_vm4, %v365_v19, 0.0  ;;  %v361_v26 = vmul.f32 %v528_v21, %v355_v24 }
 0x18a   :  { %v375_v27 = vadd.f32 %v374_v25, %v373_v23  ;;  %v376_v29 = vsel %vm368_vm4, %v366_v20, 0.0 }
 0x18b   :  { %v367_v28 = vsub.f32 %v361_v26, %v331_v22 }
 0x18c   :  { %v377_v30 = vadd.f32 %v376_v29, %v375_v27 }
 0x18d   :  { %v378_v31 = vsel %vm368_vm4, %v367_v28, 0.0 }
 0x18e   :  { %v379_v32 = vadd.f32 %v378_v31, %v377_v30 }
 0x190   :  { %380 = vadd.xlane.f32.xlu0 %v379_v32 }
 0x1ad   :  { %v450_v34 = vpop.f32.mrb[0].mxu0 }
 0x1ae   :  { %v248_v33 = vmul.f32 %v514_v56, %v450_v34  ;;  %v218_v35 = vpop.f32.mrb[1].mxu0 }
 0x1af   :  { %v247_v36 = vmul.f32 %v506_v49, %v218_v35 }
 0x1b0   :  { %255 = vst.msk [vmem:[#allocation9 + $0x8] sm:$0xff] %vm253_vm5, %v248_v33 }
 0x1b1   :  { %254 = vst.msk [vmem:[#allocation9] sm:$0xff] %vm253_vm5, %v247_v36 }
 0x1b5   :  { %v453_v37 = vpop.f32.mrb[0].mxu1 }
 0x1b6   :  { %v250_v38 = vmul.f32 %v520_v3, %v453_v37  ;;  %v228_v39 = vpop.f32.mrb[1].mxu1 }
 0x1b7   :  { %v249_v40 = vmul.f32 %v516_v58, %v228_v39 }
 0x1b8   :  { %257 = vst.msk [vmem:[#allocation9 + $0x18] sm:$0xff] %vm253_vm5, %v250_v38 }
 0x1b9   :  { %256 = vst.msk [vmem:[#allocation9 + $0x10] sm:$0xff] %vm253_vm5, %v249_v40 }
 0x1bd   :  { %v456_v41 = vpop.f32.mrb[2].mxu1 }
 0x1be   :  { %v252_v42 = vmul.f32 %v528_v21, %v456_v41  ;;  %v238_v43 = vpop.f32.mrb[3].mxu1 }
 0x1bf   :  { %v251_v44 = vmul.f32 %v524_v7, %v238_v43 }
 0x1c0   :  { %259 = vst.msk [vmem:[#allocation9 + $0x28] sm:$0xff] %vm253_vm5, %v252_v42 }
 0x1c1   :  { %258 = vst.msk [vmem:[#allocation9 + $0x20] sm:$0xff] %vm253_vm5, %v251_v44 }
 0x1c2   :  { %606 = shalt.err (!%p603_p0)
}
 0x1c3   :  { %s607_s5 = scalar_lea.hbm %s842_s3, 768 }
 0x1c4   :  { %p608_p1 = scmp.ne.s32.totalorder %s842_s3, %s607_s5  ;;  %p611_p2 = scmp.lt.u32.totalorder %s607_s5, %s842_s3 }
 0x1c6   :  { %p613_p3 = pnand %p611_p2, %p608_p1 }
 0x1c8   :  { %616 = shalt.err (!%p613_p3)
}
 0x1c9   :  { %403 = dma.vmem_to_hbm [thread:$0]  %s398_s25, 768, %s842_s3, [#allocation4], %s637_s27, %s637_s27, %s638_s28  }
 0x1ca   :  { %s617_s15 = scalar_lea.hbm %s843_s4, 16 }
 0x1cb   :  { %p618_p4 = scmp.ne.s32.totalorder %s843_s4, %s617_s15  ;;  %p621_p5 = scmp.lt.u32.totalorder %s617_s15, %s843_s4 }
 0x1cd   :  { %p623_p6 = pnand %p621_p5, %p618_p4 }
 0x21d   :  { %v381_v45 = vpop.xlane.xlu0 %380 }
 0x21e   :  { %v382_v46 = vrot.slane %v381_v45, 4 }
 0x220   :  { %v383_v47 = vadd.f32 %v382_v46, %v381_v45 }
 0x222   :  { %v384_v48 = vrot.slane %v383_v47, 2 }
 0x224   :  { %v385_v49 = vadd.f32 %v384_v48, %v383_v47 }
 0x226   :  { %v386_v50 = vrot.slane %v385_v49, 1 }
 0x228   :  { %v387_v51 = vadd.f32 %v386_v50, %v385_v49 }
 0x22a   :  { %471 = vpush %v387_v51 }
 0x25b   :  { %s472_s12 = spop %471 }
 0x25c   :  { %s389_s1 = smul.f32 0.020833334, %s472_s12 }
 0x25e   :  { %391 = sst [smem:[#allocation10]] %s389_s1 }
 0x25f   :  { %626 = shalt.err (!%p623_p6)
}
 0x260   :  { %s642_s28 = smov [#allocation10]  }
 0x261   :  { %411 = dma.smem_to_hbm %s642_s28, 16, %s843_s4, [#allocation5]  }
 0x262   :  { %631 = dma.done.wait [#allocation4], 768  }
 0x263   :  { %632 = vsyncadd [#allocation4], 4294966528 }
 0x264   :  { %633 = dma.done.wait [#allocation5], 16  }
 0x265   :  { %634 = vsyncadd [#allocation5], 4294967280 }
 0x266   :  { %418 = sfence }
 0x267   :  { %419 = vsyncpa [#allocation3], 1 }
 0x268   :  { %420 = vsyncpa [#allocation7], 1 }
 0x269   :  { %421 = vsyncpa [#allocation4], 1 }
 0x26a   :  { %422 = vsyncpa [#allocation5], 1 }

</bundles_post_ra>
